<compile_context>
chip_gen: v7x
topology: tpu7x:2x2x1
jax: 0.10.0
libtpu: 0.0.40
codegen_flags: <defaults>
</compile_context>

<pallas_src>
import functools

import jax
import jax.numpy as jnp
from jax.experimental import pallas as pl
from jax.experimental.pallas import tpu as pltpu


LANES = 128          # head output padded to the TPU lane width
NEG_SLOPE = 0.1


def _qs(t):
    """t -> (q, s) with t = 2*q + s, s in {0, 1} (Python floor semantics)."""
    return t // 2, t % 2


# -----------------------------------------------------------------------------
# Fused kernel: one image per grid step, all four layers, activations in VMEM.
# -----------------------------------------------------------------------------
def _yolo_fused_kernel(xim_ref, w1_ref, w2_ref, w3_ref, w4_ref,
                       b2_ref, b3_ref, b4_ref,
                       o_ref, y1p_ref, q_ref,
                       *, hp, wp, k1, c1f, c2, neg_slope):
    nrows = hp * wp
    f32 = jnp.float32
    bf16 = jnp.bfloat16

    def lrelu(a):
        return jnp.where(a > 0, a, neg_slope * a)

    # Halo rows (zero padding) are re-written every step.  A program_id==0
    # one-time init would be skipped on core 1 under "parallel" partitioning;
    # these are only 3 rows of bf16 (a few KB) vs. full-scratch zeroing.
    y1p_ref[0] = jnp.zeros((wp, 2 * c1f), bf16)
    q_ref[0] = jnp.zeros((wp, 3 * c2), bf16)
    q_ref[hp + 1] = jnp.zeros((wp, 3 * c2), bf16)

    # ---- layer 1: single MXU op over wrapper-built im2col (bias in K) -------
    lhs1 = xim_ref[0].reshape(nrows, k1)                        # bf16
    y1 = lrelu(jnp.dot(lhs1, w1_ref[...], preferred_element_type=f32))
    y1 = y1.reshape(hp, wp, c1f)                                # f32, folded phases

    # Pack [current col | previous col] into the 2*c1f lanes of y1p so the
    # stride-2 layer below only needs full-lane, row-sliced reads.
    col1 = jax.lax.broadcasted_iota(jnp.int32, (hp, wp, c1f), 1)
    y1_prev = jnp.where(col1 == 0, 0.0, pltpu.roll(y1, 1, 1))
    y1p_ref[pl.ds(1, hp), :, 0:c1f] = y1.astype(bf16)
    y1p_ref[pl.ds(1, hp), :, c1f:2 * c1f] = y1_prev.astype(bf16)

    # ---- layer 2: 3x3 stride-2 conv == 2x2 conv on the phase-folded y1 ------
    acc2 = jnp.zeros((nrows, c2), f32)
    for t, qr in enumerate((-1, 0)):
        lhs = y1p_ref[pl.ds(1 + qr, hp), :, :].reshape(nrows, 2 * c1f)
        acc2 += jnp.dot(lhs, w2_ref[t], preferred_element_type=f32)
    y2 = lrelu(acc2 + b2_ref[...]).reshape(hp, wp, c2)          # f32

    # Pack [col-1 | col | col+1] into the 3*c2 lanes of q for layer 3.
    col2 = jax.lax.broadcasted_iota(jnp.int32, (hp, wp, c2), 1)
    y2_prev = jnp.where(col2 == 0, 0.0, pltpu.roll(y2, 1, 1))
    y2_next = jnp.where(col2 == wp - 1, 0.0, pltpu.roll(y2, wp - 1, 1))
    q_ref[pl.ds(1, hp), :, 0:c2] = y2_prev.astype(bf16)
    q_ref[pl.ds(1, hp), :, c2:2 * c2] = y2.astype(bf16)
    q_ref[pl.ds(1, hp), :, 2 * c2:3 * c2] = y2_next.astype(bf16)

    # ---- layer 3: 3x3 stride-1 conv -> one matmul per kernel row ------------
    acc3 = jnp.zeros((nrows, c2), f32)
    for t, dy in enumerate((-1, 0, 1)):
        lhs = q_ref[pl.ds(1 + dy, hp), :, :].reshape(nrows, 3 * c2)
        acc3 += jnp.dot(lhs, w3_ref[t], preferred_element_type=f32)
    y3 = lrelu(acc3 + b3_ref[...]).astype(bf16)                 # (nrows, c2)

    # ---- layer 4: 1x1 detection head ----------------------------------------
    out = jnp.dot(y3, w4_ref[...], preferred_element_type=f32) + b4_ref[...]
    o_ref[0] = out.reshape(hp, wp, LANES).astype(o_ref.dtype)


# -----------------------------------------------------------------------------
# Wrapper-side packing (tiny, host-traced once per jit).
# -----------------------------------------------------------------------------
def _fold_nhwc(x):
    """(N,H,W,C) -> (N,H/2,W/2,4C); folded channel = C*(2*row_par+col_par)+c."""
    n, h, w, c = x.shape
    x = x.reshape(n, h // 2, 2, w // 2, 2, c)
    x = jnp.transpose(x, (0, 1, 3, 2, 4, 5))
    return x.reshape(n, h // 2, w // 2, 4 * c)


def _build_l1_im2col(x_folded, k1):
    """Concat the 9 folded spatial shifts + a ones (bias) lane; zero-pad to k1."""
    n, hp, wp, cinf = x_folded.shape
    xp = jnp.pad(x_folded, ((0, 0), (1, 1), (1, 1), (0, 0)))
    blocks = [xp[:, 1 + qr:1 + qr + hp, 1 + qc:1 + qc + wp, :]
              for qr in (-1, 0, 1) for qc in (-1, 0, 1)]
    blocks.append(jnp.ones((n, hp, wp, 1), x_folded.dtype))
    pad = k1 - 9 * cinf - 1
    if pad:
        blocks.append(jnp.zeros((n, hp, wp, pad), x_folded.dtype))
    return jnp.concatenate(blocks, axis=-1).astype(jnp.bfloat16)


def _pack_layer1(w1, b1, k1):
    """(3,3,Cin,C1),(C1,) -> (k1, 4*C1) for the phase-folded layer-1 matmul."""
    cin, c1 = w1.shape[2], w1.shape[3]
    cinf = 4 * cin
    w = jnp.zeros((k1, 4 * c1), jnp.float32)
    for pr in range(2):
        for pc in range(2):
            col0 = c1 * (2 * pr + pc)
            for dy in (-1, 0, 1):
                qr, sr = _qs(pr + dy)
                for dx in (-1, 0, 1):
                    qc, sc = _qs(pc + dx)
                    s_idx = 3 * (qr + 1) + (qc + 1)
                    row0 = cinf * s_idx + cin * (2 * sr + sc)
                    w = w.at[row0:row0 + cin, col0:col0 + c1].set(
                        w1[dy + 1, dx + 1])
    w = w.at[9 * cinf, :].set(jnp.tile(b1, 4))      # bias lane
    return w.astype(jnp.bfloat16)


def _pack_layer2(w2):
    """(3,3,C1,C2) -> (2, 8*C1, C2): stride-2 conv as 2x2 conv on folded y1."""
    c1, c2 = w2.shape[2], w2.shape[3]
    c1f = 4 * c1
    w = jnp.zeros((2, 2 * c1f, c2), jnp.float32)
    for t, qr in enumerate((-1, 0)):
        for half, qc in ((0, 0), (1, -1)):          # lanes: [cur col | prev col]
            for sr in range(2):
                for sc in range(2):
                    dy, dx = 2 * qr + sr, 2 * qc + sc
                    if abs(dy) <= 1 and abs(dx) <= 1:
                        row0 = c1f * half + c1 * (2 * sr + sc)
                        w = w.at[t, row0:row0 + c1, :].set(w2[dy + 1, dx + 1])
    return w.astype(jnp.bfloat16)


def _pack_layer3(w3):
    """(3,3,C2,C2) -> (3, 3*C2, C2): per kernel row; lanes = [col-1|col|col+1]."""
    c2 = w3.shape[3]
    w = jnp.zeros((3, 3 * c2, c2), jnp.float32)
    for t in range(3):
        for dx in range(3):
            w = w.at[t, c2 * dx:c2 * (dx + 1), :].set(w3[t, dx])
    return w.astype(jnp.bfloat16)


def _pack_head(w4, b4):
    c2, co = w4.shape[2], w4.shape[3]
    w = jnp.zeros((c2, LANES), jnp.float32).at[:, :co].set(w4[0, 0])
    b = jnp.zeros((1, LANES), jnp.float32).at[0, :co].set(b4)
    return w.astype(jnp.bfloat16), b


@jax.jit
def yolov3_forward(x_nchw, params):
    n, cin, h, w = x_nchw.shape
    assert h % 2 == 0 and w % 2 == 0
    hp, wp = h // 2, w // 2
    c1 = params["w1"].shape[3]
    c2 = params["w2"].shape[3]
    head = params["b4"].shape[0]
    c1f, cinf = 4 * c1, 4 * cin
    assert head <= LANES and 2 * c1f <= 2 * LANES and 3 * c2 <= LANES
    k1 = ((9 * cinf + 1 + 31) // 32) * 32           # im2col K (+bias), padded

    x_nhwc = jnp.transpose(x_nchw, (0, 2, 3, 1))
    xim = _build_l1_im2col(_fold_nhwc(x_nhwc), k1)  # (n, hp, wp, k1) bf16

    w1p = _pack_layer1(params["w1"], params["b1"], k1)
    w2p = _pack_layer2(params["w2"])
    w3p = _pack_layer3(params["w3"])
    w4p, b4p = _pack_head(params["w4"], params["b4"])
    b2p = params["b2"].astype(jnp.float32)[None, :]
    b3p = params["b3"].astype(jnp.float32)[None, :]

    kernel = functools.partial(_yolo_fused_kernel, hp=hp, wp=wp, k1=k1,
                               c1f=c1f, c2=c2, neg_slope=NEG_SLOPE)

    flops = 2 * n * hp * wp * (k1 * c1f + 2 * (2 * c1f) * c2
                               + 3 * (3 * c2) * c2 + c2 * LANES)
    bytes_accessed = (2 * (n * hp * wp * (k1 + LANES) + k1 * c1f
                           + 2 * 2 * c1f * c2 + 3 * 3 * c2 * c2 + c2 * LANES)
                      + 4 * (2 * c2 + LANES))

    out = pl.pallas_call(
        kernel,
        out_shape=jax.ShapeDtypeStruct((n, hp, wp, LANES), jnp.bfloat16),
        grid_spec=pltpu.PrefetchScalarGridSpec(
            num_scalar_prefetch=0,
            grid=(n,),
            in_specs=[
                pl.BlockSpec((1, hp, wp, k1), lambda i: (i, 0, 0, 0)),
                pl.BlockSpec((k1, c1f), lambda i: (0, 0)),
                pl.BlockSpec((2, 2 * c1f, c2), lambda i: (0, 0, 0)),
                pl.BlockSpec((3, 3 * c2, c2), lambda i: (0, 0, 0)),
                pl.BlockSpec((c2, LANES), lambda i: (0, 0)),
                pl.BlockSpec((1, c2), lambda i: (0, 0)),
                pl.BlockSpec((1, c2), lambda i: (0, 0)),
                pl.BlockSpec((1, LANES), lambda i: (0, 0)),
            ],
            out_specs=pl.BlockSpec((1, hp, wp, LANES), lambda i: (i, 0, 0, 0)),
            scratch_shapes=[
                pltpu.VMEM((hp + 1, wp, 2 * c1f), jnp.bfloat16),   # packed y1
                pltpu.VMEM((hp + 2, wp, 3 * c2), jnp.bfloat16),    # packed y2
            ],
        ),
        compiler_params=pltpu.CompilerParams(
            dimension_semantics=("parallel",),
            vmem_limit_bytes=32 * 1024 * 1024),
        cost_estimate=pl.CostEstimate(flops=flops, transcendentals=0,
                                      bytes_accessed=bytes_accessed),
    )(xim, w1p, w2p, w3p, w4p, b2p, b3p, b4p)

    out = out[..., :head].astype(jnp.float32)       # drop padded channels
    return jnp.transpose(out, (0, 3, 1, 2))         # NHWC -> NCHW


# -----------------------------------------------------------------------------
# Parameters + pure-JAX reference (self-check only).
# -----------------------------------------------------------------------------
def init_params(key, in_ch, num_classes, num_anchors=3):
    chans = [(in_ch, 16, 3), (16, 32, 3), (32, 32, 3),
             (32, num_anchors * (5 + num_classes), 1)]
    params = {}
    for i, (ci, co, k) in enumerate(chans, start=1):
        key, kw, kb = jax.random.split(key, 3)
        scale = 1.0 / jnp.sqrt(float(ci * k * k))
        params[f"w{i}"] = (jax.random.normal(kw, (k, k, ci, co), jnp.float32)
                           * scale)
        params[f"b{i}"] = jax.random.normal(kb, (co,), jnp.float32) * 0.01
    return params


def _reference_forward(x_nchw, params, neg=NEG_SLOPE):
    """PyTorch-convention convs (pad=K//2), bf16-rounded operands/activations."""
    def rq(v):
        return v.astype(jnp.bfloat16).astype(jnp.float32)

    def conv(x, w, b, stride, act):
        pad = w.shape[0] // 2
        y = jax.lax.conv_general_dilated(
            x, rq(w), (stride, stride), ((pad, pad), (pad, pad)),
            dimension_numbers=("NHWC", "HWIO", "NHWC"),
            precision=jax.lax.Precision.HIGHEST)
        y = y + b
        if act:
            y = jnp.where(y > 0, y, neg * y)
            y = rq(y)
        return y

    x = rq(jnp.transpose(x_nchw, (0, 2, 3, 1)))
    x = conv(x, params["w1"], params["b1"], 1, True)
    x = conv(x, params["w2"], params["b2"], 2, True)
    x = conv(x, params["w3"], params["b3"], 1, True)
    x = conv(x, params["w4"], params["b4"], 1, False)
    return jnp.transpose(x, (0, 3, 1, 2))


if __name__ == "__main__":
    key = jax.random.PRNGKey(0)
    k_in, k_par = jax.random.split(key)

    N, C, H, W = 2, 4, 16, 16
    num_classes = 4
    num_anchors = 3
    head = num_anchors * (5 + num_classes)   # 27

    x = jax.random.normal(k_in, (N, C, H, W), jnp.float32)
    params = init_params(k_par, C, num_classes, num_anchors)

    out = jax.block_until_ready(yolov3_forward(x, params))

    expected = (N, head, H // 2, W // 2)
    assert out.shape == expected, (out.shape, expected)
    assert bool(jnp.all(jnp.isfinite(out)))

    ref = _reference_forward(x, params)
    max_err = float(jnp.max(jnp.abs(out - ref)))
    assert max_err < 2e-2, f"max abs err vs reference: {max_err}"

    print("KERNEL_OK")
</pallas_src>

<mosaic_0001>
module attributes {stable_mosaic.version = 11 : i64} {
  func.func @_yolo_fused_kernel(%arg0: i32, %arg1: memref<1x8x8x160xbf16, #tpu.memory_space<vmem>>, %arg2: memref<160x64xbf16, #tpu.memory_space<vmem>>, %arg3: memref<2x128x32xbf16, #tpu.memory_space<vmem>>, %arg4: memref<3x96x32xbf16, #tpu.memory_space<vmem>>, %arg5: memref<32x128xbf16, #tpu.memory_space<vmem>>, %arg6: memref<1x32xf32, #tpu.memory_space<vmem>>, %arg7: memref<1x32xf32, #tpu.memory_space<vmem>>, %arg8: memref<1x128xf32, #tpu.memory_space<vmem>>, %arg9: memref<1x8x8x128xbf16, #tpu.memory_space<vmem>>, %arg10: memref<9x8x128xbf16, #tpu.memory_space<vmem>>, %arg11: memref<10x8x96xbf16, #tpu.memory_space<vmem>>) attributes {dimension_semantics = [#tpu.dimension_semantics<parallel>], iteration_bounds = array<i64: 2>, scalar_prefetch = 0 : i64, scratch_operands = 2 : i64, tpu.core_type = #tpu.core_type<tc>, window_params = [{transform_indices = @transform_0, window_bounds = array<i64: 1, 8, 8, 160>}, {pipeline_mode = #tpu.pipeline_mode<synchronous>, transform_indices = @transform_1, window_bounds = array<i64: 160, 64>}, {pipeline_mode = #tpu.pipeline_mode<synchronous>, transform_indices = @transform_2, window_bounds = array<i64: 2, 128, 32>}, {pipeline_mode = #tpu.pipeline_mode<synchronous>, transform_indices = @transform_3, window_bounds = array<i64: 3, 96, 32>}, {pipeline_mode = #tpu.pipeline_mode<synchronous>, transform_indices = @transform_4, window_bounds = array<i64: 32, 128>}, {pipeline_mode = #tpu.pipeline_mode<synchronous>, transform_indices = @transform_5, window_bounds = array<i64: 1, 32>}, {pipeline_mode = #tpu.pipeline_mode<synchronous>, transform_indices = @transform_6, window_bounds = array<i64: 1, 32>}, {pipeline_mode = #tpu.pipeline_mode<synchronous>, transform_indices = @transform_7, window_bounds = array<i64: 1, 128>}, {transform_indices = @transform_8, window_bounds = array<i64: 1, 8, 8, 128>}]} {
    %cst = arith.constant 0.000000e+00 : bf16
    %0 = vector.broadcast %cst : bf16 to vector<8x128xbf16>
    %c0 = arith.constant 0 : index
    %c0_0 = arith.constant 0 : index
    %c0_1 = arith.constant 0 : index
    %1 = vector.load %arg10[%c0, %c0_0, %c0_1] : memref<9x8x128xbf16, #tpu.memory_space<vmem>>, vector<1x8x128xbf16>
    %2 = vector.shape_cast %1 : vector<1x8x128xbf16> to vector<8x128xbf16>
    %3 = vector.shape_cast %0 : vector<8x128xbf16> to vector<1x8x128xbf16>
    tpu.vector_store %arg10[%c0, %c0_0, %c0_1], %3 {strides = array<i32>} : memref<9x8x128xbf16, #tpu.memory_space<vmem>>, vector<1x8x128xbf16>,
    %cst_2 = arith.constant 0.000000e+00 : bf16
    %4 = vector.broadcast %cst_2 : bf16 to vector<8x96xbf16>
    %c0_3 = arith.constant 0 : index
    %c0_4 = arith.constant 0 : index
    %c0_5 = arith.constant 0 : index
    %5 = vector.load %arg11[%c0_3, %c0_4, %c0_5] : memref<10x8x96xbf16, #tpu.memory_space<vmem>>, vector<1x8x96xbf16>
    %6 = vector.shape_cast %5 : vector<1x8x96xbf16> to vector<8x96xbf16>
    %7 = vector.shape_cast %4 : vector<8x96xbf16> to vector<1x8x96xbf16>
    tpu.vector_store %arg11[%c0_3, %c0_4, %c0_5], %7 {strides = array<i32>} : memref<10x8x96xbf16, #tpu.memory_space<vmem>>, vector<1x8x96xbf16>,
    %cst_6 = arith.constant 0.000000e+00 : bf16
    %8 = vector.broadcast %cst_6 : bf16 to vector<8x96xbf16>
    %c9 = arith.constant 9 : index
    %c0_7 = arith.constant 0 : index
    %c0_8 = arith.constant 0 : index
    %9 = vector.load %arg11[%c9, %c0_7, %c0_8] : memref<10x8x96xbf16, #tpu.memory_space<vmem>>, vector<1x8x96xbf16>
    %10 = vector.shape_cast %9 : vector<1x8x96xbf16> to vector<8x96xbf16>
    %11 = vector.shape_cast %8 : vector<8x96xbf16> to vector<1x8x96xbf16>
    tpu.vector_store %arg11[%c9, %c0_7, %c0_8], %11 {strides = array<i32>} : memref<10x8x96xbf16, #tpu.memory_space<vmem>>, vector<1x8x96xbf16>,
    %c0_9 = arith.constant 0 : index
    %c0_10 = arith.constant 0 : index
    %c0_11 = arith.constant 0 : index
    %c0_12 = arith.constant 0 : index
    %12 = vector.load %arg1[%c0_9, %c0_10, %c0_11, %c0_12] : memref<1x8x8x160xbf16, #tpu.memory_space<vmem>>, vector<1x8x8x160xbf16>
    %13 = vector.shape_cast %12 : vector<1x8x8x160xbf16> to vector<8x8x160xbf16>
    %14 = vector.shape_cast %13 : vector<8x8x160xbf16> to vector<64x160xbf16>
    %c0_13 = arith.constant 0 : index
    %c0_14 = arith.constant 0 : index
    %15 = vector.load %arg2[%c0_13, %c0_14] : memref<160x64xbf16, #tpu.memory_space<vmem>>, vector<160x64xbf16>
    %cst_15 = arith.constant dense<0.000000e+00> : vector<64x64xf32>
    %16 = tpu.matmul %14, %15, %cst_15 {dimension_numbers = #tpu.dot_dimension_numbers<[1], [0], [0], [1], [0, 0, 1, 1], [], []>} : vector<64x160xbf16>, vector<160x64xbf16>, vector<64x64xf32> -> vector<64x64xf32>
    %cst_16 = arith.constant 0.000000e+00 : f32
    %17 = vector.broadcast %cst_16 : f32 to vector<64x64xf32>
    %18 = arith.cmpf ogt, %16, %17 : vector<64x64xf32>
    %cst_17 = arith.constant 1.000000e-01 : f32
    %19 = vector.broadcast %cst_17 : f32 to vector<64x64xf32>
    %20 = arith.mulf %19, %16 : vector<64x64xf32>
    %21 = arith.select %18, %16, %20 : vector<64x64xi1>, vector<64x64xf32>
    %22 = vector.shape_cast %21 : vector<64x64xf32> to vector<8x8x64xf32>
    %23 = tpu.iota {dimensions = array<i32: 1>} : vector<8x8x64xi32>
    %c0_i32 = arith.constant 0 : i32
    %24 = vector.broadcast %c0_i32 : i32 to vector<8x8x64xi32>
    %25 = arith.cmpi eq, %23, %24 : vector<8x8x64xi32>
    %c1_i32 = arith.constant 1 : i32
    %26 = tpu.dynamic_rotate %22 by %c1_i32 dim 1 : vector<8x8x64xf32>, i32 -> vector<8x8x64xf32>
    %cst_18 = arith.constant 0.000000e+00 : f32
    %27 = vector.broadcast %cst_18 : f32 to vector<8x8x64xf32>
    %28 = arith.select %25, %27, %26 : vector<8x8x64xi1>, vector<8x8x64xf32>
    %29 = arith.truncf %22 : vector<8x8x64xf32> to vector<8x8x64xbf16>
    %c1 = arith.constant 1 : index
    %c0_19 = arith.constant 0 : index
    %c0_20 = arith.constant 0 : index
    %30 = vector.load %arg10[%c1, %c0_19, %c0_20] : memref<9x8x128xbf16, #tpu.memory_space<vmem>>, vector<8x8x64xbf16>
    tpu.vector_store %arg10[%c1, %c0_19, %c0_20], %29 {strides = array<i32>} : memref<9x8x128xbf16, #tpu.memory_space<vmem>>, vector<8x8x64xbf16>,
    %31 = arith.truncf %28 : vector<8x8x64xf32> to vector<8x8x64xbf16>
    %c1_21 = arith.constant 1 : index
    %c0_22 = arith.constant 0 : index
    %c64 = arith.constant 64 : index
    %32 = vector.load %arg10[%c1_21, %c0_22, %c64] : memref<9x8x128xbf16, #tpu.memory_space<vmem>>, vector<8x8x64xbf16>
    tpu.vector_store %arg10[%c1_21, %c0_22, %c64], %31 {strides = array<i32>} : memref<9x8x128xbf16, #tpu.memory_space<vmem>>, vector<8x8x64xbf16>,
    %cst_23 = arith.constant 0.000000e+00 : f32
    %33 = vector.broadcast %cst_23 : f32 to vector<64x32xf32>
    %c0_24 = arith.constant 0 : index
    %c0_25 = arith.constant 0 : index
    %c0_26 = arith.constant 0 : index
    %34 = vector.load %arg10[%c0_24, %c0_25, %c0_26] : memref<9x8x128xbf16, #tpu.memory_space<vmem>>, vector<8x8x128xbf16>
    %35 = vector.shape_cast %34 : vector<8x8x128xbf16> to vector<64x128xbf16>
    %c0_27 = arith.constant 0 : index
    %c0_28 = arith.constant 0 : index
    %c0_29 = arith.constant 0 : index
    %36 = vector.load %arg3[%c0_27, %c0_28, %c0_29] : memref<2x128x32xbf16, #tpu.memory_space<vmem>>, vector<1x128x32xbf16>
    %37 = vector.shape_cast %36 : vector<1x128x32xbf16> to vector<128x32xbf16>
    %cst_30 = arith.constant dense<0.000000e+00> : vector<64x32xf32>
    %38 = tpu.matmul %35, %37, %cst_30 {dimension_numbers = #tpu.dot_dimension_numbers<[1], [0], [0], [1], [0, 0, 1, 1], [], []>} : vector<64x128xbf16>, vector<128x32xbf16>, vector<64x32xf32> -> vector<64x32xf32>
    %39 = arith.addf %33, %38 : vector<64x32xf32>
    %c1_31 = arith.constant 1 : index
    %c0_32 = arith.constant 0 : index
    %c0_33 = arith.constant 0 : index
    %40 = vector.load %arg10[%c1_31, %c0_32, %c0_33] : memref<9x8x128xbf16, #tpu.memory_space<vmem>>, vector<8x8x128xbf16>
    %41 = vector.shape_cast %40 : vector<8x8x128xbf16> to vector<64x128xbf16>
    %c1_34 = arith.constant 1 : index
    %c0_35 = arith.constant 0 : index
    %c0_36 = arith.constant 0 : index
    %42 = vector.load %arg3[%c1_34, %c0_35, %c0_36] : memref<2x128x32xbf16, #tpu.memory_space<vmem>>, vector<1x128x32xbf16>
    %43 = vector.shape_cast %42 : vector<1x128x32xbf16> to vector<128x32xbf16>
    %cst_37 = arith.constant dense<0.000000e+00> : vector<64x32xf32>
    %44 = tpu.matmul %41, %43, %cst_37 {dimension_numbers = #tpu.dot_dimension_numbers<[1], [0], [0], [1], [0, 0, 1, 1], [], []>} : vector<64x128xbf16>, vector<128x32xbf16>, vector<64x32xf32> -> vector<64x32xf32>
    %45 = arith.addf %39, %44 : vector<64x32xf32>
    %c0_38 = arith.constant 0 : index
    %c0_39 = arith.constant 0 : index
    %46 = vector.load %arg6[%c0_38, %c0_39] : memref<1x32xf32, #tpu.memory_space<vmem>>, vector<1x32xf32>
    %47 = vector.broadcast %46 : vector<1x32xf32> to vector<64x32xf32>
    %48 = arith.addf %45, %47 : vector<64x32xf32>
    %cst_40 = arith.constant 0.000000e+00 : f32
    %49 = vector.broadcast %cst_40 : f32 to vector<64x32xf32>
    %50 = arith.cmpf ogt, %48, %49 : vector<64x32xf32>
    %cst_41 = arith.constant 1.000000e-01 : f32
    %51 = vector.broadcast %cst_41 : f32 to vector<64x32xf32>
    %52 = arith.mulf %51, %48 : vector<64x32xf32>
    %53 = arith.select %50, %48, %52 : vector<64x32xi1>, vector<64x32xf32>
    %54 = vector.shape_cast %53 : vector<64x32xf32> to vector<8x8x32xf32>
    %55 = tpu.iota {dimensions = array<i32: 1>} : vector<8x8x32xi32>
    %c0_i32_42 = arith.constant 0 : i32
    %56 = vector.broadcast %c0_i32_42 : i32 to vector<8x8x32xi32>
    %57 = arith.cmpi eq, %55, %56 : vector<8x8x32xi32>
    %c1_i32_43 = arith.constant 1 : i32
    %58 = tpu.dynamic_rotate %54 by %c1_i32_43 dim 1 : vector<8x8x32xf32>, i32 -> vector<8x8x32xf32>
    %cst_44 = arith.constant 0.000000e+00 : f32
    %59 = vector.broadcast %cst_44 : f32 to vector<8x8x32xf32>
    %60 = arith.select %57, %59, %58 : vector<8x8x32xi1>, vector<8x8x32xf32>
    %c7_i32 = arith.constant 7 : i32
    %61 = vector.broadcast %c7_i32 : i32 to vector<8x8x32xi32>
    %62 = arith.cmpi eq, %55, %61 : vector<8x8x32xi32>
    %c7_i32_45 = arith.constant 7 : i32
    %63 = tpu.dynamic_rotate %54 by %c7_i32_45 dim 1 : vector<8x8x32xf32>, i32 -> vector<8x8x32xf32>
    %cst_46 = arith.constant 0.000000e+00 : f32
    %64 = vector.broadcast %cst_46 : f32 to vector<8x8x32xf32>
    %65 = arith.select %62, %64, %63 : vector<8x8x32xi1>, vector<8x8x32xf32>
    %66 = arith.truncf %60 : vector<8x8x32xf32> to vector<8x8x32xbf16>
    %c1_47 = arith.constant 1 : index
    %c0_48 = arith.constant 0 : index
    %c0_49 = arith.constant 0 : index
    %67 = vector.load %arg11[%c1_47, %c0_48, %c0_49] : memref<10x8x96xbf16, #tpu.memory_space<vmem>>, vector<8x8x32xbf16>
    tpu.vector_store %arg11[%c1_47, %c0_48, %c0_49], %66 {strides = array<i32>} : memref<10x8x96xbf16, #tpu.memory_space<vmem>>, vector<8x8x32xbf16>,
    %68 = arith.truncf %54 : vector<8x8x32xf32> to vector<8x8x32xbf16>
    %c1_50 = arith.constant 1 : index
    %c0_51 = arith.constant 0 : index
    %c32 = arith.constant 32 : index
    %69 = vector.load %arg11[%c1_50, %c0_51, %c32] : memref<10x8x96xbf16, #tpu.memory_space<vmem>>, vector<8x8x32xbf16>
    tpu.vector_store %arg11[%c1_50, %c0_51, %c32], %68 {strides = array<i32>} : memref<10x8x96xbf16, #tpu.memory_space<vmem>>, vector<8x8x32xbf16>,
    %70 = arith.truncf %65 : vector<8x8x32xf32> to vector<8x8x32xbf16>
    %c1_52 = arith.constant 1 : index
    %c0_53 = arith.constant 0 : index
    %c64_54 = arith.constant 64 : index
    %71 = vector.load %arg11[%c1_52, %c0_53, %c64_54] : memref<10x8x96xbf16, #tpu.memory_space<vmem>>, vector<8x8x32xbf16>
    tpu.vector_store %arg11[%c1_52, %c0_53, %c64_54], %70 {strides = array<i32>} : memref<10x8x96xbf16, #tpu.memory_space<vmem>>, vector<8x8x32xbf16>,
    %cst_55 = arith.constant 0.000000e+00 : f32
    %72 = vector.broadcast %cst_55 : f32 to vector<64x32xf32>
    %c0_56 = arith.constant 0 : index
    %c0_57 = arith.constant 0 : index
    %c0_58 = arith.constant 0 : index
    %73 = vector.load %arg11[%c0_56, %c0_57, %c0_58] : memref<10x8x96xbf16, #tpu.memory_space<vmem>>, vector<8x8x96xbf16>
    %74 = vector.shape_cast %73 : vector<8x8x96xbf16> to vector<64x96xbf16>
    %c0_59 = arith.constant 0 : index
    %c0_60 = arith.constant 0 : index
    %c0_61 = arith.constant 0 : index
    %75 = vector.load %arg4[%c0_59, %c0_60, %c0_61] : memref<3x96x32xbf16, #tpu.memory_space<vmem>>, vector<1x96x32xbf16>
    %76 = vector.shape_cast %75 : vector<1x96x32xbf16> to vector<96x32xbf16>
    %cst_62 = arith.constant dense<0.000000e+00> : vector<64x32xf32>
    %77 = tpu.matmul %74, %76, %cst_62 {dimension_numbers = #tpu.dot_dimension_numbers<[1], [0], [0], [1], [0, 0, 1, 1], [], []>} : vector<64x96xbf16>, vector<96x32xbf16>, vector<64x32xf32> -> vector<64x32xf32>
    %78 = arith.addf %72, %77 : vector<64x32xf32>
    %c1_63 = arith.constant 1 : index
    %c0_64 = arith.constant 0 : index
    %c0_65 = arith.constant 0 : index
    %79 = vector.load %arg11[%c1_63, %c0_64, %c0_65] : memref<10x8x96xbf16, #tpu.memory_space<vmem>>, vector<8x8x96xbf16>
    %80 = vector.shape_cast %79 : vector<8x8x96xbf16> to vector<64x96xbf16>
    %c1_66 = arith.constant 1 : index
    %c0_67 = arith.constant 0 : index
    %c0_68 = arith.constant 0 : index
    %81 = vector.load %arg4[%c1_66, %c0_67, %c0_68] : memref<3x96x32xbf16, #tpu.memory_space<vmem>>, vector<1x96x32xbf16>
    %82 = vector.shape_cast %81 : vector<1x96x32xbf16> to vector<96x32xbf16>
    %cst_69 = arith.constant dense<0.000000e+00> : vector<64x32xf32>
    %83 = tpu.matmul %80, %82, %cst_69 {dimension_numbers = #tpu.dot_dimension_numbers<[1], [0], [0], [1], [0, 0, 1, 1], [], []>} : vector<64x96xbf16>, vector<96x32xbf16>, vector<64x32xf32> -> vector<64x32xf32>
    %84 = arith.addf %78, %83 : vector<64x32xf32>
    %c2 = arith.constant 2 : index
    %c0_70 = arith.constant 0 : index
    %c0_71 = arith.constant 0 : index
    %85 = vector.load %arg11[%c2, %c0_70, %c0_71] : memref<10x8x96xbf16, #tpu.memory_space<vmem>>, vector<8x8x96xbf16>
    %86 = vector.shape_cast %85 : vector<8x8x96xbf16> to vector<64x96xbf16>
    %c2_72 = arith.constant 2 : index
    %c0_73 = arith.constant 0 : index
    %c0_74 = arith.constant 0 : index
    %87 = vector.load %arg4[%c2_72, %c0_73, %c0_74] : memref<3x96x32xbf16, #tpu.memory_space<vmem>>, vector<1x96x32xbf16>
    %88 = vector.shape_cast %87 : vector<1x96x32xbf16> to vector<96x32xbf16>
    %cst_75 = arith.constant dense<0.000000e+00> : vector<64x32xf32>
    %89 = tpu.matmul %86, %88, %cst_75 {dimension_numbers = #tpu.dot_dimension_numbers<[1], [0], [0], [1], [0, 0, 1, 1], [], []>} : vector<64x96xbf16>, vector<96x32xbf16>, vector<64x32xf32> -> vector<64x32xf32>
    %90 = arith.addf %84, %89 : vector<64x32xf32>
    %c0_76 = arith.constant 0 : index
    %c0_77 = arith.constant 0 : index
    %91 = vector.load %arg7[%c0_76, %c0_77] : memref<1x32xf32, #tpu.memory_space<vmem>>, vector<1x32xf32>
    %92 = vector.broadcast %91 : vector<1x32xf32> to vector<64x32xf32>
    %93 = arith.addf %90, %92 : vector<64x32xf32>
    %cst_78 = arith.constant 0.000000e+00 : f32
    %94 = vector.broadcast %cst_78 : f32 to vector<64x32xf32>
    %95 = arith.cmpf ogt, %93, %94 : vector<64x32xf32>
    %cst_79 = arith.constant 1.000000e-01 : f32
    %96 = vector.broadcast %cst_79 : f32 to vector<64x32xf32>
    %97 = arith.mulf %96, %93 : vector<64x32xf32>
    %98 = arith.select %95, %93, %97 : vector<64x32xi1>, vector<64x32xf32>
    %99 = arith.truncf %98 : vector<64x32xf32> to vector<64x32xbf16>
    %c0_80 = arith.constant 0 : index
    %c0_81 = arith.constant 0 : index
    %100 = vector.load %arg5[%c0_80, %c0_81] : memref<32x128xbf16, #tpu.memory_space<vmem>>, vector<32x128xbf16>
    %cst_82 = arith.constant dense<0.000000e+00> : vector<64x128xf32>
    %101 = tpu.matmul %99, %100, %cst_82 {dimension_numbers = #tpu.dot_dimension_numbers<[1], [0], [0], [1], [0, 0, 1, 1], [], []>} : vector<64x32xbf16>, vector<32x128xbf16>, vector<64x128xf32> -> vector<64x128xf32>
    %c0_83 = arith.constant 0 : index
    %c0_84 = arith.constant 0 : index
    %102 = vector.load %arg8[%c0_83, %c0_84] : memref<1x128xf32, #tpu.memory_space<vmem>>, vector<1x128xf32>
    %103 = vector.broadcast %102 : vector<1x128xf32> to vector<64x128xf32>
    %104 = arith.addf %101, %103 : vector<64x128xf32>
    %105 = vector.shape_cast %104 : vector<64x128xf32> to vector<8x8x128xf32>
    %106 = arith.truncf %105 : vector<8x8x128xf32> to vector<8x8x128xbf16>
    %c0_85 = arith.constant 0 : index
    %c0_86 = arith.constant 0 : index
    %c0_87 = arith.constant 0 : index
    %c0_88 = arith.constant 0 : index
    %107 = vector.load %arg9[%c0_85, %c0_86, %c0_87, %c0_88] : memref<1x8x8x128xbf16, #tpu.memory_space<vmem>>, vector<1x8x8x128xbf16>
    %108 = vector.shape_cast %107 : vector<1x8x8x128xbf16> to vector<8x8x128xbf16>
    %109 = vector.shape_cast %106 : vector<8x8x128xbf16> to vector<1x8x8x128xbf16>
    tpu.vector_store %arg9[%c0_85, %c0_86, %c0_87, %c0_88], %109 {strides = array<i32>} : memref<1x8x8x128xbf16, #tpu.memory_space<vmem>>, vector<1x8x8x128xbf16>,
    return
  }
  func.func @transform_0(%arg0: i32) -> (i32, i32, i32, i32) {
    %c0_i32 = arith.constant 0 : i32
    %c0_i32_0 = arith.constant 0 : i32
    %c0_i32_1 = arith.constant 0 : i32
    %c0_i32_2 = arith.constant 0 : i32
    return %arg0, %c0_i32, %c0_i32_0, %c0_i32_1 : i32, i32, i32, i32
  }
  func.func @transform_1(%arg0: i32) -> (i32, i32) {
    %c0_i32 = arith.constant 0 : i32
    %c0_i32_0 = arith.constant 0 : i32
    %c0_i32_1 = arith.constant 0 : i32
    return %c0_i32, %c0_i32_0 : i32, i32
  }
  func.func @transform_2(%arg0: i32) -> (i32, i32, i32) {
    %c0_i32 = arith.constant 0 : i32
    %c0_i32_0 = arith.constant 0 : i32
    %c0_i32_1 = arith.constant 0 : i32
    %c0_i32_2 = arith.constant 0 : i32
    return %c0_i32, %c0_i32_0, %c0_i32_1 : i32, i32, i32
  }
  func.func @transform_3(%arg0: i32) -> (i32, i32, i32) {
    %c0_i32 = arith.constant 0 : i32
    %c0_i32_0 = arith.constant 0 : i32
    %c0_i32_1 = arith.constant 0 : i32
    %c0_i32_2 = arith.constant 0 : i32
    return %c0_i32, %c0_i32_0, %c0_i32_1 : i32, i32, i32
  }
  func.func @transform_4(%arg0: i32) -> (i32, i32) {
    %c0_i32 = arith.constant 0 : i32
    %c0_i32_0 = arith.constant 0 : i32
    %c0_i32_1 = arith.constant 0 : i32
    return %c0_i32, %c0_i32_0 : i32, i32
  }
  func.func @transform_5(%arg0: i32) -> (i32, i32) {
    %c0_i32 = arith.constant 0 : i32
    %c0_i32_0 = arith.constant 0 : i32
    %c0_i32_1 = arith.constant 0 : i32
    return %c0_i32, %c0_i32_0 : i32, i32
  }
  func.func @transform_6(%arg0: i32) -> (i32, i32) {
    %c0_i32 = arith.constant 0 : i32
    %c0_i32_0 = arith.constant 0 : i32
    %c0_i32_1 = arith.constant 0 : i32
    return %c0_i32, %c0_i32_0 : i32, i32
  }
  func.func @transform_7(%arg0: i32) -> (i32, i32) {
    %c0_i32 = arith.constant 0 : i32
    %c0_i32_0 = arith.constant 0 : i32
    %c0_i32_1 = arith.constant 0 : i32
    return %c0_i32, %c0_i32_0 : i32, i32
  }
  func.func @transform_8(%arg0: i32) -> (i32, i32, i32, i32) {
    %c0_i32 = arith.constant 0 : i32
    %c0_i32_0 = arith.constant 0 : i32
    %c0_i32_1 = arith.constant 0 : i32
    %c0_i32_2 = arith.constant 0 : i32
    return %arg0, %c0_i32, %c0_i32_0, %c0_i32_1 : i32, i32, i32, i32
  }
}

</mosaic_0001>

<bundles_post_ra>
// kernel: tile.8
= control target key start
LH: loop header
LB: loop body
LE: loop exit
PB: predicated region body
PF: predicated region fallthrough
CT: control target
= control target key end

     0   :  { %v8_v1 = vmov 0.0   ;;  %s25_s0 = inlined_call_operand.vmem [shape: f32[16], index: 0, kind: input, shape index: {}]   ;;  %s26_s1 = inlined_call_operand.vmem [shape: bf16[4,16], index: 1, kind: output, shape index: {}]  }
   0x1   :  { %v4_v0 = vld [vmem:[%s25_s0] ss:$0 sm:$0xff] }
   0x2   :  { %v5_v2 = vpack.c.bf16 %v8_v1, %v4_v0 }
   0x4   :  { %6 = vst [vmem:[%s26_s1] sm:$0x3] %v5_v2 }

// kernel: yolov3_forward.1
= control target key start
LH: loop header
LB: loop body
LE: loop exit
PB: predicated region body
PF: predicated region fallthrough
CT: control target
= control target key end

     0   :  { %s2438_s27 = smov 0   ;;  %s2807_s0 = inlined_call_operand.vmem [shape: bf16[2,8,8,160], index: 0, kind: input, shape index: {}]   ;;  %s2808_s1 = inlined_call_operand.vmem [shape: bf16[160,64], index: 1, kind: input, shape index: {}]   ;;  %s2809_s2 = inlined_call_operand.vmem [shape: bf16[2,128,32], index: 2, kind: input, shape index: {}]   ;;  %s2810_s3 = inlined_call_operand.vmem [shape: bf16[3,96,32], index: 3, kind: input, shape index: {}]   ;;  %s2811_s4 = inlined_call_operand.vmem [shape: bf16[32,128], index: 4, kind: input, shape index: {}]   ;;  %s2812_s5 = inlined_call_operand.vmem [shape: f32[1,32], index: 5, kind: input, shape index: {}]   ;;  %s2813_s6 = inlined_call_operand.vmem [shape: f32[1,32], index: 6, kind: input, shape index: {}]   ;;  %s2814_s7 = inlined_call_operand.vmem [shape: f32[1,128], index: 7, kind: input, shape index: {}]   ;;  %s2815_s8 = inlined_call_operand.vmem [shape: bf16[2,8,8,128], index: 8, kind: output, shape index: {}]  }
   0x1 LB: > { %s1868_s28 = sadd.s32 4294967295, %s2388_s27   ;;  %p1872_p0 = scmp.ge.s32.totalorder %s2388_s27, 1  ;;  %s2388_s27 = sphi %s2438_s27, %s18_s27  }
   0x2   : > { %p262_p1 = scmp.lt.s32.totalorder %s2388_s27, 3 }
   0x4   : > { %p263_p2 = pnand %p1872_p0, %p262_p1 }
   0x5   : > { %v2304_v0 = vld [vmem:[%s2808_s1] sm:$0xff] (!%p263_p2)   ;;  %v2390_v1 = vmov (!%p263_p2), 0   ;;  %p296_p3 = scmp.lt.s32.totalorder (!%p263_p2), %s1868_s28, 1  ;;  %v2305_v2 = vld [vmem:[%s2808_s1 + $0x8] sm:$0xff] (!%p263_p2)   ;;  %v2306_v3 = vld [vmem:[%s2808_s1 + $0x10] sm:$0xff] (!%p263_p2)   ;;  %vm436_vm0 = vcmask (!%p263_p2), 261120   ;;  %v538_v22 = vlaneseq (!%p263_p2) }
   0x6   : > { %266 = sbr.rel (%p263_p2) target bundleno = 1265 (0x4f1), region = 52  ;;  %449 = vmatprep.subr.bf16.mxu0 (!%p263_p2), %v2390_v1  ;;  %307 = vst [vmem:[#allocation2] sm:$0xf] (!%p263_p2), %v2390_v1  ;;  %v2307_v4 = vld [vmem:[%s2808_s1 + $0x18] sm:$0xff] (!%p263_p2)   ;;  %v2308_v6 = vld [vmem:[%s2808_s1 + $0x20] sm:$0xff] (!%p263_p2)   ;;  %v2309_v7 = vld [vmem:[%s2808_s1 + $0x28] sm:$0xff] (!%p263_p2)  }
   0x7   : > { %450 = vmatpush1.bf16.msra.mxu0 (!%p263_p2), %v2304_v0  ;;  %v2310_v8 = vld [vmem:[%s2808_s1 + $0x30] sm:$0xff] (!%p263_p2)   ;;  %v2311_v9 = vld [vmem:[%s2808_s1 + $0x38] sm:$0xff] (!%p263_p2)   ;;  %v2312_v10 = vld [vmem:[%s2808_s1 + $0x40] sm:$0xff] (!%p263_p2)   ;;  %v2519_v24 = vshrl.u32 (!%p263_p2), %v538_v22, 7  ;;  %vm566_vm4 = vcmask (!%p263_p2), 519168   ;;  %s2391_s25 = smov (!%p263_p2), 64  }
   0x8   : > { %451 = vmatprep.subr.bf16.mxu0 (!%p263_p2), %v2390_v1  ;;  %v2313_v11 = vld [vmem:[%s2808_s1 + $0x48] sm:$0xff] (!%p263_p2)   ;;  %v2326_v19 = vld [vmem:[%s2809_s2 + $0x40] sm:$0xff] (!%p263_p2)   ;;  %v2328_v21 = vld [vmem:[%s2809_s2 + $0x50] sm:$0xff] (!%p263_p2)   ;;  %vm631_vm11 = vcmask (!%p263_p2), 1043968   ;;  %s2392_s26 = smov (!%p263_p2), 32  }
   0x9   : > { %v2327_v20 = vld [vmem:[%s2809_s2 + $0x48] sm:$0xff] (!%p263_p2)   ;;  %2149 = vmatprep.subr.bf16.mxu1 (!%p263_p2), %v2326_v19  ;;  %v2329_v23 = vld [vmem:[%s2809_s2 + $0x58] sm:$0xff] (!%p263_p2)   ;;  %v2330_v25 = vld [vmem:[%s2809_s2 + $0x60] sm:$0xff] (!%p263_p2)   ;;  %vm540_vm2 = vcmp.eq.s32.totalorder (!%p263_p2), %v2519_v24, 0  ;;  %vm1018_vm15 = vcmp.eq.s32.totalorder (!%p263_p2), %v2519_v24, 7 }
   0xa   : > { %2150 = vmatpush3.bf16.msra.mxu1 (!%p263_p2), %v2326_v19  ;;  %v2331_v30 = vld [vmem:[%s2809_s2 + $0x68] sm:$0xff] (!%p263_p2)   ;;  %v2332_v40 = vld [vmem:[%s2809_s2 + $0x70] sm:$0xff] (!%p263_p2)   ;;  %v2334_v47 = vld [vmem:[%s2809_s2 + $0x78] sm:$0xff] (!%p263_p2)  }
   0xb   : > { %452 = vmatpush1.bf16.msra.mxu0 (!%p263_p2), %v2305_v2  ;;  %2151 = vmatprep.subr.bf16.mxu1 (!%p263_p2), %v2327_v20  ;;  %v2544_v54 = vld [vmem:[%s2809_s2] sm:$0xff] (!%p263_p2)  }
   0xc   : > { %453 = vmatprep.subr.bf16.mxu0 (!%p263_p2), %v2390_v1 }
   0xd   : > { %s2817_s28 = smov (!%p296_p3, %s1868_s28), 1 }
   0xe   : > { %s2040_s11 = sshll.u32 %s2817_s28, 6  ;;  %2152 = vmatpush3.bf16.msra.mxu1 %v2327_v20  ;;  %s2041_s13 = sshll.u32 %s2817_s28, 5 }
   0xf   : > { %s2465_s16 = scalar_lea.vmem %s2807_s0, %s2040_s11  ;;  %454 = vmatpush1.bf16.msra.mxu0 %v2306_v3  ;;  %2153 = vmatprep.subr.bf16.mxu1 %v2328_v21  ;;  %s305_s15 = scalar_lea.vmem %s2815_s8, %s2041_s13 }
  0x10   : > { %455 = vmatprep.subr.bf16.mxu0 %v2390_v1  ;;  %v2316_v5 = vld [vmem:[%s2465_s16 + $0x4] ss:$8 sps:$4 sm:$0xff]   ;;  %v2314_v12 = vld [vmem:[%s2465_s16] ss:$8 sps:$4 sm:$0xff]   ;;  %v2317_v13 = vld [vmem:[%s2465_s16 + $0x14] ss:$8 sps:$4 sm:$0xff]  }
  0x11   : > { %1895 = vmatprep.mubr.msk.bf16.mxu0 %vm436_vm0, %v2316_v5  ;;  %v2319_v14 = vld [vmem:[%s2465_s16 + $0x10] ss:$8 sps:$4 sm:$0xff]   ;;  %v2320_v15 = vld [vmem:[%s2465_s16 + $0x24] ss:$8 sps:$4 sm:$0xff]   ;;  %v2322_v16 = vld [vmem:[%s2465_s16 + $0x20] ss:$8 sps:$4 sm:$0xff]  }
  0x12   : > { %v2323_v17 = vld [vmem:[%s2465_s16 + $0x34] ss:$8 sps:$4 sm:$0xff]   ;;  %v2325_v18 = vld [vmem:[%s2465_s16 + $0x30] ss:$8 sps:$4 sm:$0xff]   ;;  %2154 = vmatpush3.bf16.msra.mxu1 %v2328_v21 }
  0x13   : > { %456 = vmatpush1.bf16.msra.mxu0 %v2307_v4  ;;  %2155 = vmatprep.subr.bf16.mxu1 %v2329_v23 }
  0x14   : > { %457 = vmatprep.subr.bf16.mxu0 %v2390_v1 }
  0x16   : > { %2156 = vmatpush3.bf16.msra.mxu1 %v2329_v23 }
  0x17   : > { %458 = vmatpush1.bf16.msra.mxu0 %v2308_v6  ;;  %2157 = vmatprep.subr.bf16.mxu1 %v2330_v25 }
  0x18   : > { %459 = vmatprep.subr.bf16.mxu0 %v2390_v1 }
  0x1a   : > { %2158 = vmatpush3.bf16.msra.mxu1 %v2330_v25 }
  0x1b   : > { %460 = vmatpush1.bf16.msra.mxu0 %v2309_v7  ;;  %2159 = vmatprep.subr.bf16.mxu1 %v2331_v30 }
  0x1c   : > { %461 = vmatprep.subr.bf16.mxu0 %v2390_v1 }
  0x1e   : > { %2160 = vmatpush3.bf16.msra.mxu1 %v2331_v30 }
  0x1f   : > { %462 = vmatpush1.bf16.msra.mxu0 %v2310_v8  ;;  %2161 = vmatprep.subr.bf16.mxu1 %v2332_v40 }
  0x20   : > { %463 = vmatprep.subr.bf16.mxu0 %v2390_v1 }
  0x22   : > { %2162 = vmatpush3.bf16.msra.mxu1 %v2332_v40 }
  0x23   : > { %464 = vmatpush1.bf16.msra.mxu0 %v2311_v9  ;;  %2163 = vmatprep.subr.bf16.mxu1 %v2334_v47 }
  0x24   : > { %465 = vmatprep.subr.bf16.mxu0 %v2390_v1 }
  0x26   : > { %2164 = vmatpush3.bf16.msra.mxu1 %v2334_v47 }
  0x27   : > { %466 = vmatpush1.bf16.msra.mxu0 %v2312_v10  ;;  %2173 = vmatprep.subr.bf16.mxu1 %v2544_v54 }
  0x28   : > { %467 = vmatprep.subr.bf16.mxu0 %v2390_v1 }
  0x2b   : > { %468 = vmatpush1.bf16.msra.mxu0 %v2313_v11 }
  0x2e   : > { %482 = vmatmul.mubr.bf16.vlgmr.msra.gmra.mrb[0].mxu0 %v2314_v12 }
  0x2f   : > { %1896 = vmatprep.mubr.msk.bf16.mxu0 %vm436_vm0, %v2317_v13 }
  0x36   : > { %490 = vmatmul.mubr.bf16.gmra.mrb[4].mxu0 %v2319_v14 }
  0x37   : > { %1897 = vmatprep.mubr.msk.bf16.mxu0 %vm436_vm0, %v2320_v15 }
  0x3e   : > { %498 = vmatmul.mubr.bf16.gmra.mrb[8].mxu0 %v2322_v16 }
  0x3f   : > { %1898 = vmatprep.mubr.msk.bf16.mxu0 %vm436_vm0, %v2323_v17 }
  0x46   : > { %506 = vmatmul.mubr.bf16.gmra.mrb[12].mxu0 %v2325_v18 }
 0x101   : > { %v483_v26 = vpop.f32.mrb[0].mxu0 }
 0x102   : > { %vm514_vm1 = vcmp.gt.f32.partialorder %v483_v26, 0.0  ;;  %v522_v27 = vmul.f32 0.1, %v483_v26  ;;  %v485_v28 = vpop.f32.mrb[1].mxu0 }
 0x103   : > { %v486_v29 = vpop.f32.mrb[2].mxu0 }
 0x104   : > { %v530_v31 = vsel %vm514_vm1, %v483_v26, %v522_v27  ;;  %vm515_vm3 = vcmp.gt.f32.partialorder %v486_v29, 0.0  ;;  %v523_v32 = vmul.f32 0.1, %v486_v29  ;;  %v488_v33 = vpop.f32.mrb[3].mxu0 }
 0x105   : > { %v557_v34 = vpack.c.bf16 %v530_v31, %v530_v31  ;;  %v541_v35 = vrot.slane %v530_v31, 7 }
 0x106   : > { %v531_v36 = vsel %vm515_vm3, %v486_v29, %v523_v32 }
 0x107   : > { %v542_v37 = vrot.slane %v531_v36, 7  ;;  %v558_v38 = vpack.c.bf16 %v531_v36, %v531_v36  ;;  %v549_v39 = vsel %vm540_vm2, 0.0, %v541_v35  ;;  %567 = vst.msk [vmem:[#allocation2 + $0x4] sm:$0xf] %vm566_vm4, %v557_v34 }
 0x108   : > { %v2042_v41 = vpack.c.bf16 %v549_v39, %v549_v39  ;;  %v2337_v39 = vld [vmem:[%s2809_s2 + $0x8] sm:$0xff]  }
 0x109   : > { %v491_v42 = vpop.f32.mrb[4].mxu0  ;;  %v550_v43 = vsel %vm540_vm2, 0.0, %v542_v37  ;;  %568 = vst.msk [vmem:[#allocation2 + $0x8] sm:$0xf] %vm566_vm4, %v558_v38 }
 0x10a   : > { %vm516_vm5 = vcmp.gt.f32.partialorder %v491_v42, 0.0  ;;  %v524_v44 = vmul.f32 0.1, %v491_v42  ;;  %607 = vrot.lane.b32.xlu0 %v2042_v41, %s2391_s25  ;;  %v493_v45 = vpop.f32.mrb[5].mxu0  ;;  %v2043_v51 = vpack.c.bf16 %v550_v43, %v550_v43 }
 0x10b   : > { %v494_v46 = vpop.f32.mrb[6].mxu0  ;;  %v2340_v45 = vld [vmem:[%s2809_s2 + $0x18] sm:$0xff]  }
 0x10c   : > { %v532_v48 = vsel %vm516_vm5, %v491_v42, %v524_v44  ;;  %vm517_vm6 = vcmp.gt.f32.partialorder %v494_v46, 0.0  ;;  %v525_v49 = vmul.f32 0.1, %v494_v46  ;;  %v496_v50 = vpop.f32.mrb[7].mxu0  ;;  %v2338_v42 = vld [vmem:[%s2809_s2 + $0x10] sm:$0xff]  }
 0x10d   : > { %v559_v52 = vpack.c.bf16 %v532_v48, %v532_v48  ;;  %v543_v53 = vrot.slane %v532_v48, 7  ;;  %v2345_v50 = vld [vmem:[%s2809_s2 + $0x30] sm:$0xff]  }
 0x10e   : > { %v533_v55 = vsel %vm517_vm6, %v494_v46, %v525_v49  ;;  %609 = vrot.lane.b32.xlu0 %v2043_v51, %s2391_s25  ;;  %v2342_v46 = vld [vmem:[%s2809_s2 + $0x20] sm:$0xff]   ;;  %v2344_v49 = vld [vmem:[%s2809_s2 + $0x28] sm:$0xff]   ;;  %v2346_v51 = vld [vmem:[%s2809_s2 + $0x38] sm:$0xff]  }
 0x10f   : > { %v544_v56 = vrot.slane %v533_v55, 7  ;;  %v560_v57 = vpack.c.bf16 %v533_v55, %v533_v55  ;;  %v551_v58 = vsel %vm540_vm2, 0.0, %v543_v53  ;;  %569 = vst.msk [vmem:[#allocation2 + $0xc] sm:$0xf] %vm566_vm4, %v559_v52  ;;  %v2350_v55 = vld [vmem:[%s2810_s3] sm:$0xff]  }
 0x110   : > { %v2044_v59 = vpack.c.bf16 %v551_v58, %v551_v58  ;;  %2217 = vmatprep.subr.bf16.mxu0 %v2350_v55  ;;  %v2353_v58 = vld [vmem:[%s2810_s3 + $0x30] sm:$0xff]  }
 0x111   : > { %v499_v60 = vpop.f32.mrb[8].mxu0  ;;  %v552_v61 = vsel %vm540_vm2, 0.0, %v544_v56  ;;  %570 = vst.msk [vmem:[#allocation2 + $0x10] sm:$0xf] %vm566_vm4, %v560_v57  ;;  %v2351_v56 = vld [vmem:[%s2810_s3 + $0x8] sm:$0xff]   ;;  %2218 = vmatpush3.bf16.msra.mxu0 %v2350_v55  ;;  %v2352_v57 = vld [vmem:[%s2810_s3 + $0x10] sm:$0xff]  }
 0x112   : > { %vm518_vm7 = vcmp.gt.f32.partialorder %v499_v60, 0.0  ;;  %v526_v62 = vmul.f32 0.1, %v499_v60  ;;  %611 = vrot.lane.b32.xlu1 %v2044_v59, %s2391_s25  ;;  %v501_v63 = vpop.f32.mrb[9].mxu0  ;;  %v2045_v3 = vpack.c.bf16 %v552_v61, %v552_v61  ;;  %2219 = vmatprep.subr.bf16.mxu0 %v2351_v56  ;;  %v1947_v59 = vld [vmem:[%s2812_s5] ss:$0 sm:$0xff] }
 0x113   : > { %v502_v0 = vpop.f32.mrb[10].mxu0  ;;  %v2354_v61 = vld [vmem:[%s2810_s3 + $0x18] sm:$0xff]  }
 0x114   : > { %v534_v2 = vsel %vm518_vm7, %v499_v60, %v526_v62  ;;  %vm519_vm8 = vcmp.gt.f32.partialorder %v502_v0, 0.0  ;;  %v527_v4 = vmul.f32 0.1, %v502_v0  ;;  %v504_v5 = vpop.f32.mrb[11].mxu0  ;;  %v2355_v62 = vld [vmem:[%s2810_s3 + $0x38] sm:$0xff]   ;;  %vm1044_vm7 = vcmask 257024  }
 0x115   : > { %v545_v6 = vrot.slane %v534_v2, 7  ;;  %v561_v7 = vpack.c.bf16 %v534_v2, %v534_v2  ;;  %2220 = vmatpush3.bf16.msra.mxu0 %v2351_v56 }
 0x116   : > { %613 = vrot.lane.b32.xlu1 %v2045_v3, %s2391_s25  ;;  %v535_v8 = vsel %vm519_vm8, %v502_v0, %v527_v4  ;;  %2221 = vmatprep.subr.bf16.mxu0 %v2352_v57  ;;  %vm308_vm8 = vcmask 781312  }
 0x117   : > { %v546_v9 = vrot.slane %v535_v8, 7  ;;  %v562_v10 = vpack.c.bf16 %v535_v8, %v535_v8  ;;  %v553_v11 = vsel %vm540_vm2, 0.0, %v545_v6  ;;  %571 = vst.msk [vmem:[#allocation2 + $0x14] sm:$0xf] %vm566_vm4, %v561_v7  ;;  %v2356_v8 = vld [vmem:[%s2810_s3 + $0x40] sm:$0xff]  }
 0x118   : > { %v2046_v12 = vpack.c.bf16 %v553_v11, %v553_v11  ;;  %309 = vst.msk [vmem:[#allocation3] sm:$0xf] %vm308_vm8, %v2390_v1  ;;  %311 = vst.msk [vmem:[#allocation3 + $0x24] sm:$0xf] %vm308_vm8, %v2390_v1 }
 0x119   : > { %v507_v13 = vpop.f32.mrb[12].mxu0  ;;  %v554_v14 = vsel %vm540_vm2, 0.0, %v546_v9  ;;  %572 = vst.msk [vmem:[#allocation2 + $0x18] sm:$0xf] %vm566_vm4, %v562_v10  ;;  %2222 = vmatpush3.bf16.msra.mxu0 %v2352_v57 }
 0x11a   : > { %vm520_vm9 = vcmp.gt.f32.partialorder %v507_v13, 0.0  ;;  %v528_v15 = vmul.f32 0.1, %v507_v13  ;;  %615 = vrot.lane.b32.xlu0 %v2046_v12, %s2391_s25  ;;  %v509_v16 = vpop.f32.mrb[13].mxu0  ;;  %v2047_v17 = vpack.c.bf16 %v554_v14, %v554_v14  ;;  %2223 = vmatprep.subr.bf16.mxu0 %v2354_v61  ;;  %v2357_v12 = vld [vmem:[%s2810_s3 + $0x20] sm:$0xff]  }
 0x11b   : > { %v510_v18 = vpop.f32.mrb[14].mxu0 }
 0x11c   : > { %v536_v19 = vsel %vm520_vm9, %v507_v13, %v528_v15  ;;  %vm521_vm10 = vcmp.gt.f32.partialorder %v510_v18, 0.0  ;;  %v529_v20 = vmul.f32 0.1, %v510_v18  ;;  %617 = vrot.lane.b32.xlu1 %v2047_v17, %s2391_s25  ;;  %v512_v21 = vpop.f32.mrb[15].mxu0  ;;  %vm1174_vm9 = vcmask 781824  }
 0x11d   : > { %v547_v22 = vrot.slane %v536_v19, 7  ;;  %v563_v23 = vpack.c.bf16 %v536_v19, %v536_v19  ;;  %2224 = vmatpush3.bf16.msra.mxu0 %v2354_v61 }
 0x11e   : > { %v537_v25 = vsel %vm521_vm10, %v510_v18, %v529_v20  ;;  %2225 = vmatprep.subr.bf16.mxu0 %v2357_v12  ;;  %v2358_v18 = vld [vmem:[%s2810_s3 + $0x48] sm:$0xff]   ;;  %vm1280_vm10 = vcmask 785408  }
 0x11f   : > { %v548_v26 = vrot.slane %v537_v25, 7  ;;  %v564_v27 = vpack.c.bf16 %v537_v25, %v537_v25  ;;  %v555_v28 = vsel %vm540_vm2, 0.0, %v547_v22  ;;  %573 = vst.msk [vmem:[#allocation2 + $0x1c] sm:$0xf] %vm566_vm4, %v563_v23 }
 0x120   : > { %v2048_v29 = vpack.c.bf16 %v555_v28, %v555_v28 }
 0x121   : > { %v556_v30 = vsel %vm540_vm2, 0.0, %v548_v26  ;;  %574 = vst.msk [vmem:[#allocation2 + $0x20] sm:$0xf] %vm566_vm4, %v564_v27  ;;  %2226 = vmatpush3.bf16.msra.mxu0 %v2357_v12 }
 0x122   : > { %619 = vrot.lane.b32.xlu0 %v2048_v29, %s2391_s25  ;;  %v2049_v31 = vpack.c.bf16 %v556_v30, %v556_v30 }
 0x124   : > { %621 = vrot.lane.b32.xlu1 %v2049_v31, %s2391_s25 }
 0x17c   : > { %v608_v32 = vpop.permute.xlu0 %607 }
 0x17d   : > { %632 = vst.msk [vmem:[#allocation2 + $0x4] sm:$0xf] %vm631_vm11, %v608_v32 }
 0x180   : > { %v610_v33 = vpop.permute.xlu0 %609 }
 0x181   : > { %633 = vst.msk [vmem:[#allocation2 + $0x8] sm:$0xf] %vm631_vm11, %v610_v33 }
 0x184   : > { %v612_v34 = vpop.permute.xlu1 %611  ;;  %v2343_v48 = vld [vmem:[#allocation2] sm:$0xff]  }
 0x185   : > { %634 = vst.msk [vmem:[#allocation2 + $0xc] sm:$0xf] %vm631_vm11, %v612_v34 }
 0x188   : > { %v614_v35 = vpop.permute.xlu1 %613  ;;  %v2333_v36 = vld [vmem:[#allocation2 + $0x4] sm:$0xff]  }
 0x189   : > { %635 = vst.msk [vmem:[#allocation2 + $0x10] sm:$0xf] %vm631_vm11, %v614_v35  ;;  %2165 = vmatprep.mubr.bf16.mxu1 %v2333_v36  ;;  %v2359_v36 = vld [vmem:[%s2810_s3 + $0x28] sm:$0xff]  }
 0x18a   : > { %2227 = vmatprep.subr.bf16.mxu0 %v2359_v36 }
 0x18b   : > { %2228 = vmatpush3.bf16.msra.mxu0 %v2359_v36 }
 0x18c   : > { %v616_v37 = vpop.permute.xlu0 %615  ;;  %v2347_v52 = vld [vmem:[#allocation2 + $0x8] sm:$0xff]  }
 0x18d   : > { %636 = vst.msk [vmem:[#allocation2 + $0x14] sm:$0xf] %vm631_vm11, %v616_v37  ;;  %v2360_v37 = vld [vmem:[%s2810_s3 + $0x50] sm:$0xff]  }
 0x18e   : > { %v618_v38 = vpop.permute.xlu1 %617 }
 0x18f   : > { %637 = vst.msk [vmem:[#allocation2 + $0x18] sm:$0xf] %vm631_vm11, %v618_v38 }
 0x190   : > { %v2336_v40 = vld [vmem:[#allocation2 + $0xc] sm:$0xff]  }
 0x191   : > { %2166 = vmatmul.mubr.bf16.vlgmr.msra.gmra.mrb[0].mxu1 %v2336_v40 }
 0x192   : > { %2174 = vmatpush3.bf16.msra.mxu1 %v2544_v54 }
 0x193   : > { %2175 = vmatprep.subr.bf16.mxu1 %v2337_v39 }
 0x194   : > { %v620_v41 = vpop.permute.xlu0 %619  ;;  %v2348_v53 = vld [vmem:[#allocation2 + $0x10] sm:$0xff]  }
 0x195   : > { %638 = vst.msk [vmem:[#allocation2 + $0x1c] sm:$0xf] %vm631_vm11, %v620_v41 }
 0x196   : > { %v622_v43 = vpop.permute.xlu1 %621  ;;  %v2339_v44 = vld [vmem:[#allocation2 + $0x14] sm:$0xff]   ;;  %2176 = vmatpush3.bf16.msra.mxu1 %v2337_v39 }
 0x197   : > { %639 = vst.msk [vmem:[#allocation2 + $0x20] sm:$0xf] %vm631_vm11, %v622_v43  ;;  %2177 = vmatprep.subr.bf16.mxu1 %v2338_v42  ;;  %2169 = vmatprep.mubr.bf16.mxu1 %v2339_v44 }
 0x19a   : > { %2178 = vmatpush3.bf16.msra.mxu1 %v2338_v42 }
 0x19b   : > { %2179 = vmatprep.subr.bf16.mxu1 %v2340_v45 }
 0x19c   : > { %v2349_v54 = vld [vmem:[#allocation2 + $0x18] sm:$0xff]  }
 0x19e   : > { %v2341_v47 = vld [vmem:[#allocation2 + $0x1c] sm:$0xff]   ;;  %2180 = vmatpush3.bf16.msra.mxu1 %v2340_v45 }
 0x19f   : > { %2170 = vmatmul.mubr.bf16.gmra.mrb[4].mxu1 %v2341_v47  ;;  %2181 = vmatprep.subr.bf16.mxu1 %v2342_v46 }
 0x1a0   : > { %2189 = vmatprep.mubr.bf16.mxu1 %v2343_v48  ;;  %v2672_v48 = vld [vmem:[%s2810_s3 + $0x60] sm:$0xff]  }
 0x1a1   : > { %2237 = vmatprep.subr.bf16.mxu0 %v2672_v48 }
 0x1a2   : > { %2182 = vmatpush3.bf16.msra.mxu1 %v2342_v46 }
 0x1a3   : > { %2183 = vmatprep.subr.bf16.mxu1 %v2344_v49 }
 0x1a6   : > { %2184 = vmatpush3.bf16.msra.mxu1 %v2344_v49  ;;  %v2364_v49 = vld [vmem:[%s2810_s3 + $0x58] sm:$0xff]  }
 0x1a7   : > { %2185 = vmatprep.subr.bf16.mxu1 %v2345_v50 }
 0x1aa   : > { %2186 = vmatpush3.bf16.msra.mxu1 %v2345_v50 }
 0x1ab   : > { %2187 = vmatprep.subr.bf16.mxu1 %v2346_v51 }
 0x1ae   : > { %2188 = vmatpush3.bf16.msra.mxu1 %v2346_v51 }
 0x1af   : > { %2197 = vmatprep.subr.bf16.mxu1 %v2353_v58 }
 0x1b1   : > { %2190 = vmatmul.mubr.bf16.vlgmr.msra.gmra.mrb[0].mxu1 %v2347_v52 }
 0x1b2   : > { %2193 = vmatprep.mubr.bf16.mxu1 %v2348_v53  ;;  %2198 = vmatpush3.bf16.msra.mxu1 %v2353_v58 }
 0x1b3   : > { %2199 = vmatprep.subr.bf16.mxu1 %v2355_v62 }
 0x1b6   : > { %2200 = vmatpush3.bf16.msra.mxu1 %v2355_v62 }
 0x1b7   : > { %2201 = vmatprep.subr.bf16.mxu1 %v2356_v8 }
 0x1b9   : > { %2194 = vmatmul.mubr.bf16.gmra.mrb[4].mxu1 %v2349_v54 }
 0x1ba   : > { %2202 = vmatpush3.bf16.msra.mxu1 %v2356_v8 }
 0x1bb   : > { %2203 = vmatprep.subr.bf16.mxu1 %v2358_v18 }
 0x1be   : > { %2204 = vmatpush3.bf16.msra.mxu1 %v2358_v18 }
 0x1bf   : > { %2205 = vmatprep.subr.bf16.mxu1 %v2360_v37 }
 0x1c2   : > { %2206 = vmatpush3.bf16.msra.mxu1 %v2360_v37 }
 0x1c3   : > { %2207 = vmatprep.subr.bf16.mxu1 %v2364_v49 }
 0x1c6   : > { %2208 = vmatpush3.bf16.msra.mxu1 %v2364_v49 }
 0x284   : > { %v2191_v60 = vpop.f32.mrb[0].mxu1 }
 0x285   : > { %v972_v63 = vadd.f32 %v2191_v60, %v1947_v59  ;;  %v932_v0 = vpop.f32.mrb[1].mxu1 }
 0x286   : > { %v970_v2 = vadd.f32 %v1947_v59, %v932_v0  ;;  %v2192_v3 = vpop.f32.mrb[2].mxu1 }
 0x287   : > { %vm980_vm12 = vcmp.gt.f32.partialorder %v972_v63, 0.0  ;;  %v988_v4 = vmul.f32 0.1, %v972_v63  ;;  %v935_v5 = vpop.f32.mrb[3].mxu1  ;;  %v973_v10 = vadd.f32 %v2192_v3, %v1947_v59 }
 0x288   : > { %vm978_vm13 = vcmp.gt.f32.partialorder %v970_v2, 0.0  ;;  %v986_v6 = vmul.f32 0.1, %v970_v2  ;;  %v971_v7 = vadd.f32 %v1947_v59, %v935_v5 }
 0x289   : > { %v2626_v9 = vsel %vm980_vm12, %v972_v63, %v988_v4  ;;  %v989_v19 = vmul.f32 0.1, %v973_v10  ;;  %vm981_vm1 = vcmp.gt.f32.partialorder %v973_v10, 0.0 }
 0x28a   : > { %vm979_vm14 = vcmp.gt.f32.partialorder %v971_v7, 0.0  ;;  %v987_v11 = vmul.f32 0.1, %v971_v7  ;;  %v2631_v13 = vsel %vm978_vm13, %v970_v2, %v986_v6  ;;  %v2052_v14 = vpack.c.bf16 %v2626_v9, %v2626_v9 }
 0x28b   : > { %v1021_v17 = vrot.slane %v2626_v9, 1  ;;  %v1019_v28 = vrot.slane %v2631_v13, 1  ;;  %v2050_v32 = vpack.c.bf16 %v2631_v13, %v2631_v13  ;;  %v997_v38 = vsel %vm981_vm1, %v973_v10, %v989_v19 }
 0x28c   : > { %v2636_v15 = vsel %vm979_vm14, %v971_v7, %v987_v11  ;;  %v2195_v16 = vpop.f32.mrb[4].mxu1  ;;  %1089 = vrot.lane.b32.xlu0 %v2052_v14, %s2392_s26  ;;  %v1004_v43 = vrot.slane %v2626_v9, 7  ;;  %v1022_v47 = vrot.slane %v997_v38, 1  ;;  %v1002_v54 = vrot.slane %v2631_v13, 7 }
 0x28d   : > { %v976_v20 = vadd.f32 %v2195_v16, %v1947_v59  ;;  %v948_v21 = vpop.f32.mrb[5].mxu1  ;;  %v2051_v22 = vpack.c.bf16 %v2636_v15, %v2636_v15  ;;  %v1020_v23 = vrot.slane %v2636_v15, 1  ;;  %v1029_v27 = vsel %vm1018_vm15, 0.0, %v1021_v17 }
 0x28e   : > { %v974_v25 = vadd.f32 %v1947_v59, %v948_v21  ;;  %v2196_v26 = vpop.f32.mrb[6].mxu1  ;;  %v2060_v40 = vpack.c.bf16 %v1029_v27, %v1029_v27  ;;  %v1027_v42 = vsel %vm1018_vm15, 0.0, %v1019_v28  ;;  %v1003_v50 = vrot.slane %v2636_v15, 7 }
 0x28f   : > { %v992_v29 = vmul.f32 0.1, %v976_v20  ;;  %v977_v30 = vadd.f32 %v2196_v26, %v1947_v59  ;;  %1087 = vrot.lane.b32.xlu1 %v2051_v22, %s2392_s26  ;;  %v951_v31 = vpop.f32.mrb[7].mxu1  ;;  %vm984_vm3 = vcmp.gt.f32.partialorder %v976_v20, 0.0  ;;  %v1028_v35 = vsel %vm1018_vm15, 0.0, %v1020_v23 }
 0x290   : > { %v990_v33 = vmul.f32 0.1, %v974_v25  ;;  %v975_v34 = vadd.f32 %v1947_v59, %v951_v31  ;;  %vm982_vm4 = vcmp.gt.f32.partialorder %v974_v25, 0.0  ;;  %1085 = vrot.lane.b32.xlu0 %v2050_v32, %s2392_s26  ;;  %v2059_v45 = vpack.c.bf16 %v1028_v35, %v1028_v35 }
 0x291   : > { %v993_v39 = vmul.f32 0.1, %v977_v30  ;;  %vm985_vm5 = vcmp.gt.f32.partialorder %v977_v30, 0.0  ;;  %v2666_v44 = vsel %vm984_vm3, %v976_v20, %v992_v29  ;;  %v2058_v53 = vpack.c.bf16 %v1027_v42, %v1027_v42 }
 0x292   : > { %vm983_vm6 = vcmp.gt.f32.partialorder %v975_v34, 0.0  ;;  %v991_v41 = vmul.f32 0.1, %v975_v34  ;;  %v998_v46 = vsel %vm982_vm4, %v974_v25, %v990_v33  ;;  %v1005_v55 = vrot.slane %v997_v38, 7 }
 0x293   : > { %1154 = vrot.lane.b32.xlu1 %v2060_v40, %s2391_s25  ;;  %v2679_v51 = vsel %vm985_vm5, %v977_v30, %v993_v39  ;;  %v1008_v56 = vrot.slane %v2666_v44, 7  ;;  %v1030_v57 = vsel %vm1018_vm15, 0.0, %v1022_v47  ;;  %v1006_v58 = vrot.slane %v998_v46, 7  ;;  %v2368_v47 = vld [vmem:[%s2810_s3 + $0x70] sm:$0xff]  }
 0x294   : > { %v999_v52 = vsel %vm983_vm6, %v975_v34, %v991_v41  ;;  %1152 = vrot.lane.b32.xlu0 %v2059_v45, %s2391_s25  ;;  %v2053_v59 = vpack.c.bf16 %v997_v38, %v997_v38  ;;  %v1012_v60 = vsel %vm540_vm2, 0.0, %v1004_v43  ;;  %v1009_v61 = vrot.slane %v2679_v51, 7  ;;  %v2366_v45 = vld [vmem:[%s2810_s3 + $0x68] sm:$0xff]  }
 0x295   : > { %v1007_v62 = vrot.slane %v999_v52, 7  ;;  %v2056_v63 = vpack.c.bf16 %v2666_v44, %v2666_v44  ;;  %v2061_v0 = vpack.c.bf16 %v1030_v57, %v1030_v57  ;;  %v1023_v2 = vrot.slane %v998_v46, 1 }
 0x296   : > { %v1037_v3 = vpack.c.bf16 %v1012_v60, %v1012_v60  ;;  %v1011_v4 = vsel %vm540_vm2, 0.0, %v1003_v50  ;;  %v1010_v6 = vsel %vm540_vm2, 0.0, %v1002_v54  ;;  %v1013_v7 = vsel %vm540_vm2, 0.0, %v1005_v55  ;;  %v2373_v55 = vld [vmem:[%s2810_s3 + $0x80] sm:$0xff]  }
 0x297   : > { %1150 = vrot.lane.b32.xlu1 %v2058_v53, %s2391_s25  ;;  %v1036_v5 = vpack.c.bf16 %v1011_v4, %v1011_v4  ;;  %v1016_v8 = vsel %vm540_vm2, 0.0, %v1008_v56  ;;  %v1035_v9 = vpack.c.bf16 %v1010_v6, %v1010_v6  ;;  %v1038_v10 = vpack.c.bf16 %v1013_v7, %v1013_v7 }
 0x298   : > { %1091 = vrot.lane.b32.xlu0 %v2053_v59, %s2392_s26  ;;  %1047 = vst.msk [vmem:[#allocation3 + $0xc] sm:$0xf] %vm1044_vm7, %v1037_v3  ;;  %v1041_v11 = vpack.c.bf16 %v1016_v8, %v1016_v8  ;;  %v1014_v12 = vsel %vm540_vm2, 0.0, %v1006_v58  ;;  %v1024_v13 = vrot.slane %v999_v52, 1  ;;  %v1015_v15 = vsel %vm540_vm2, 0.0, %v1007_v62  ;;  %v2376_v59 = vld [vmem:[%s2810_s3 + $0x88] sm:$0xff]  }
 0x299   : > { %1046 = vst.msk [vmem:[#allocation3 + $0x8] sm:$0xf] %vm1044_vm7, %v1036_v5  ;;  %v1039_v14 = vpack.c.bf16 %v1014_v12, %v1014_v12  ;;  %v2054_v16 = vpack.c.bf16 %v998_v46, %v998_v46  ;;  %1045 = vst.msk [vmem:[#allocation3 + $0x4] sm:$0xf] %vm1044_vm7, %v1035_v9  ;;  %v1040_v17 = vpack.c.bf16 %v1015_v15, %v1015_v15  ;;  %v1017_v18 = vsel %vm540_vm2, 0.0, %v1009_v61 }
 0x29a   : > { %1048 = vst.msk [vmem:[#allocation3 + $0x10] sm:$0xf] %vm1044_vm7, %v1038_v10  ;;  %1051 = vst.msk [vmem:[#allocation3 + $0x1c] sm:$0xf] %vm1044_vm7, %v1041_v11  ;;  %v1031_v19 = vsel %vm1018_vm15, 0.0, %v1023_v2  ;;  %v1025_v20 = vrot.slane %v2666_v44, 1  ;;  %v1042_v21 = vpack.c.bf16 %v1017_v18, %v1017_v18  ;;  %v2055_v22 = vpack.c.bf16 %v999_v52, %v999_v52 }
 0x29b   : > { %1097 = vrot.lane.b32.xlu1 %v2056_v63, %s2392_s26  ;;  %1049 = vst.msk [vmem:[#allocation3 + $0x14] sm:$0xf] %vm1044_vm7, %v1039_v14  ;;  %1050 = vst.msk [vmem:[#allocation3 + $0x18] sm:$0xf] %vm1044_vm7, %v1040_v17  ;;  %v1032_v23 = vsel %vm1018_vm15, 0.0, %v1024_v13  ;;  %v2062_v1 = vpack.c.bf16 %v1031_v19, %v1031_v19  ;;  %v1026_v26 = vrot.slane %v2679_v51, 1  ;;  %v2057_v30 = vpack.c.bf16 %v2679_v51, %v2679_v51 }
 0x29c   : > { %1156 = vrot.lane.b32.xlu0 %v2061_v0, %s2391_s25  ;;  %1052 = vst.msk [vmem:[#allocation3 + $0x20] sm:$0xf] %vm1044_vm7, %v1042_v21  ;;  %v1033_v25 = vsel %vm1018_vm15, 0.0, %v1025_v20  ;;  %v2063_v27 = vpack.c.bf16 %v1032_v23, %v1032_v23  ;;  %vm1109_vm2 = vcmask 519424   ;;  %v2380_v0 = vld [vmem:[%s2811_s4] sm:$0xff]   ;;  %v2381_v2 = vld [vmem:[%s2811_s4 + $0x8] sm:$0xff]  }
 0x29d   : > { %v2064_v28 = vpack.c.bf16 %v1033_v25, %v1033_v25  ;;  %v1034_v29 = vsel %vm1018_vm15, 0.0, %v1026_v26  ;;  %2257 = vmatprep.subr.bf16.mxu1 %v2380_v0  ;;  %v2030_v12 = vld [vmem:[%s2813_s6] ss:$0 sm:$0xff] }
 0x29e   : > { %v2065_v31 = vpack.c.bf16 %v1034_v29, %v1034_v29 }
 0x29f   : > { %1093 = vrot.lane.b32.xlu1 %v2054_v16, %s2392_s26 }
 0x2a0   : > { %1095 = vrot.lane.b32.xlu0 %v2055_v22, %s2392_s26 }
 0x2a3   : > { %1158 = vrot.lane.b32.xlu1 %v2062_v1, %s2391_s25 }
 0x2a4   : > { %1160 = vrot.lane.b32.xlu0 %v2063_v27, %s2391_s25 }
 0x2a7   : > { %1162 = vrot.lane.b32.xlu1 %v2064_v28, %s2391_s25 }
 0x2a8   : > { %1099 = vrot.lane.b32.xlu0 %v2057_v30, %s2392_s26 }
 0x2ab   : > { %1164 = vrot.lane.b32.xlu1 %v2065_v31, %s2391_s25 }
 0x2fe   : > { %v1090_v32 = vpop.permute.xlu0 %1089 }
 0x2ff   : > { %1112 = vst.msk [vmem:[#allocation3 + $0xc] sm:$0xf] %vm1109_vm2, %v1090_v32 }
 0x301   : > { %v1088_v33 = vpop.permute.xlu1 %1087 }
 0x302   : > { %1111 = vst.msk [vmem:[#allocation3 + $0x8] sm:$0xf] %vm1109_vm2, %v1088_v33  ;;  %v1086_v34 = vpop.permute.xlu0 %1085 }
 0x303   : > { %1110 = vst.msk [vmem:[#allocation3 + $0x4] sm:$0xf] %vm1109_vm2, %v1086_v34 }
 0x305   : > { %v1155_v24 = vpop.permute.xlu1 %1154 }
 0x306   : > { %1177 = vst.msk [vmem:[#allocation3 + $0xc] sm:$0xf] %vm1174_vm9, %v1155_v24  ;;  %v1153_v35 = vpop.permute.xlu0 %1152 }
 0x307   : > { %1176 = vst.msk [vmem:[#allocation3 + $0x8] sm:$0xf] %vm1174_vm9, %v1153_v35 }
 0x309   : > { %v1151_v36 = vpop.permute.xlu1 %1150 }
 0x30a   : > { %1175 = vst.msk [vmem:[#allocation3 + $0x4] sm:$0xf] %vm1174_vm9, %v1151_v36  ;;  %v1092_v37 = vpop.permute.xlu0 %1091 }
 0x30b   : > { %1113 = vst.msk [vmem:[#allocation3 + $0x10] sm:$0xf] %vm1109_vm2, %v1092_v37 }
 0x30d   : > { %v1098_v38 = vpop.permute.xlu1 %1097 }
 0x30e   : > { %1116 = vst.msk [vmem:[#allocation3 + $0x1c] sm:$0xf] %vm1109_vm2, %v1098_v38  ;;  %v1157_v39 = vpop.permute.xlu0 %1156  ;;  %v2365_v44 = vld [vmem:[#allocation3 + $0x8] sm:$0xff]  }
 0x30f   : > { %1178 = vst.msk [vmem:[#allocation3 + $0x10] sm:$0xf] %vm1174_vm9, %v1157_v39  ;;  %v2374_v58 = vld [vmem:[#allocation3 + $0x8] sm:$0xff]  }
 0x311   : > { %v1094_v40 = vpop.permute.xlu1 %1093  ;;  %v2361_v41 = vld [vmem:[#allocation3 + $0x4] sm:$0xff]  }
 0x312   : > { %1114 = vst.msk [vmem:[#allocation3 + $0x14] sm:$0xf] %vm1109_vm2, %v1094_v40  ;;  %v2362_v42 = vld [vmem:[#allocation3] sm:$0xff]   ;;  %v1096_v43 = vpop.permute.xlu0 %1095  ;;  %2209 = vmatprep.mubr.msk.bf16.mxu1 %vm1280_vm10, %v2361_v41 }
 0x313   : > { %1115 = vst.msk [vmem:[#allocation3 + $0x18] sm:$0xf] %vm1109_vm2, %v1096_v43  ;;  %2229 = vmatprep.mubr.msk.bf16.mxu0 %vm1280_vm10, %v2362_v42 }
 0x314   : > { %2230 = vmatmul.mubr.msk.bf16.vlgmr.msra.gmra.mrb[16].mxu0 %vm1280_vm10, %v2365_v44 }
 0x315   : > { %v1159_v46 = vpop.permute.xlu1 %1158  ;;  %2238 = vmatpush3.bf16.msra.mxu0 %v2672_v48  ;;  %v2370_v48 = vld [vmem:[%s2810_s3 + $0x78] sm:$0xff]  }
 0x316   : > { %1179 = vst.msk [vmem:[#allocation3 + $0x14] sm:$0xf] %vm1174_vm9, %v1159_v46  ;;  %v1161_v49 = vpop.permute.xlu0 %1160  ;;  %2239 = vmatprep.subr.bf16.mxu0 %v2366_v45  ;;  %v2367_v50 = vld [vmem:[#allocation3 + $0xc] sm:$0xff]  }
 0x317   : > { %1180 = vst.msk [vmem:[#allocation3 + $0x18] sm:$0xf] %vm1174_vm9, %v1161_v49  ;;  %2210 = vmatmul.mubr.msk.bf16.vlgmr.msra.gmra.mrb[8].mxu1 %vm1280_vm10, %v2367_v50 }
 0x318   : > { %2258 = vmatpush3.bf16.msra.mxu1 %v2380_v0 }
 0x319   : > { %v1163_v51 = vpop.permute.xlu1 %1162  ;;  %2240 = vmatpush3.bf16.msra.mxu0 %v2366_v45  ;;  %2259 = vmatprep.subr.bf16.mxu1 %v2381_v2 }
 0x31a   : > { %1181 = vst.msk [vmem:[#allocation3 + $0x1c] sm:$0xf] %vm1174_vm9, %v1163_v51  ;;  %v1100_v52 = vpop.permute.xlu0 %1099  ;;  %2241 = vmatprep.subr.bf16.mxu0 %v2368_v47 }
 0x31b   : > { %1117 = vst.msk [vmem:[#allocation3 + $0x20] sm:$0xf] %vm1109_vm2, %v1100_v52 }
 0x31c   : > { %2260 = vmatpush3.bf16.msra.mxu1 %v2381_v2 }
 0x31d   : > { %v1165_v53 = vpop.permute.xlu1 %1164  ;;  %v2369_v54 = vld [vmem:[#allocation3 + $0x10] sm:$0xff]   ;;  %2242 = vmatpush3.bf16.msra.mxu0 %v2368_v47 }
 0x31e   : > { %1182 = vst.msk [vmem:[#allocation3 + $0x20] sm:$0xf] %vm1174_vm9, %v1165_v53  ;;  %2233 = vmatprep.mubr.msk.bf16.mxu0 %vm1280_vm10, %v2369_v54  ;;  %2243 = vmatprep.subr.bf16.mxu0 %v2370_v48  ;;  %v2371_v56 = vld [vmem:[#allocation3 + $0x14] sm:$0xff]  }
 0x31f   : > { %2213 = vmatprep.mubr.msk.bf16.mxu1 %vm1280_vm10, %v2371_v56  ;;  %v2377_v61 = vld [vmem:[#allocation3 + $0x10] sm:$0xff]   ;;  %v2031_v56 = vld [vmem:[%s2814_s7] ss:$0 sm:$0xff] }
 0x321   : > { %v2372_v57 = vld [vmem:[#allocation3 + $0x18] sm:$0xff]   ;;  %2244 = vmatpush3.bf16.msra.mxu0 %v2370_v48 }
 0x322   : > { %2234 = vmatmul.mubr.msk.bf16.gmra.mrb[20].mxu0 %vm1280_vm10, %v2372_v57  ;;  %2245 = vmatprep.subr.bf16.mxu0 %v2373_v55  ;;  %v2378_v62 = vld [vmem:[#allocation3 + $0x18] sm:$0xff]  }
 0x323   : > { %2249 = vmatprep.mubr.msk.bf16.mxu0 %vm1280_vm10, %v2374_v58 }
 0x325   : > { %v2375_v60 = vld [vmem:[#allocation3 + $0x1c] sm:$0xff]   ;;  %2246 = vmatpush3.bf16.msra.mxu0 %v2373_v55 }
 0x326   : > { %2214 = vmatmul.mubr.msk.bf16.gmra.mrb[12].mxu1 %vm1280_vm10, %v2375_v60  ;;  %2247 = vmatprep.subr.bf16.mxu0 %v2376_v59  ;;  %v2379_v63 = vld [vmem:[#allocation3 + $0x20] sm:$0xff]  }
 0x329   : > { %2248 = vmatpush3.bf16.msra.mxu0 %v2376_v59 }
 0x32c   : > { %2250 = vmatmul.mubr.msk.bf16.vlgmr.msra.gmra.mrb[16].mxu0 %vm1280_vm10, %v2377_v61 }
 0x32d   : > { %2253 = vmatprep.mubr.msk.bf16.mxu0 %vm1280_vm10, %v2378_v62 }
 0x334   : > { %2254 = vmatmul.mubr.msk.bf16.gmra.mrb[20].mxu0 %vm1280_vm10, %v2379_v63 }
 0x3ea   : > { %v2211_v3 = vpop.f32.mrb[8].mxu1 }
 0x3eb   : > { %v1327_v4 = vpop.f32.mrb[9].mxu1 }
 0x3ec   : > { %v2212_v5 = vpop.f32.mrb[10].mxu1 }
 0x3ed   : > { %v1330_v6 = vpop.f32.mrb[11].mxu1 }
 0x3f9   : > { %v2215_v7 = vpop.f32.mrb[12].mxu1 }
 0x3fa   : > { %v1343_v8 = vpop.f32.mrb[13].mxu1 }
 0x3fb   : > { %v2216_v9 = vpop.f32.mrb[14].mxu1 }
 0x3fc   : > { %v1346_v10 = vpop.f32.mrb[15].mxu1 }
 0x3ff   : > { %v2251_v11 = vpop.f32.mrb[16].mxu0 }
 0x400   : > { %v2269_v13 = vadd.f32 %v2251_v11, %v2211_v3  ;;  %v1615_v14 = vpop.f32.mrb[17].mxu0 }
 0x401   : > { %v2270_v15 = vadd.f32 %v1615_v14, %v1327_v4  ;;  %v2252_v16 = vpop.f32.mrb[18].mxu0 }
 0x402   : > { %v1663_v17 = vadd.f32 %v2269_v13, %v2030_v12  ;;  %v2271_v18 = vadd.f32 %v2252_v16, %v2212_v5  ;;  %v1618_v19 = vpop.f32.mrb[19].mxu0 }
 0x403   : > { %v1661_v20 = vadd.f32 %v2270_v15, %v2030_v12  ;;  %v2272_v21 = vadd.f32 %v1618_v19, %v1330_v6 }
 0x404   : > { %v1679_v22 = vmul.f32 0.1, %v1663_v17  ;;  %v1664_v23 = vadd.f32 %v2271_v18, %v2030_v12  ;;  %vm1671_vm11 = vcmp.gt.f32.partialorder %v1663_v17, 0.0 }
 0x405   : > { %v1677_v1 = vmul.f32 0.1, %v1661_v20  ;;  %v1662_v25 = vadd.f32 %v2272_v21, %v2030_v12  ;;  %vm1669_vm12 = vcmp.gt.f32.partialorder %v1661_v20, 0.0 }
 0x406   : > { %vm1672_vm13 = vcmp.gt.f32.partialorder %v1664_v23, 0.0  ;;  %v1680_v26 = vmul.f32 0.1, %v1664_v23  ;;  %v1687_v29 = vsel %vm1671_vm11, %v1663_v17, %v1679_v22 }
 0x407   : > { %vm1670_vm14 = vcmp.gt.f32.partialorder %v1662_v25, 0.0  ;;  %v1678_v27 = vmul.f32 0.1, %v1662_v25  ;;  %v2255_v28 = vpop.f32.mrb[20].mxu0  ;;  %v1685_v33 = vsel %vm1669_vm12, %v1661_v20, %v1677_v1 }
 0x408   : > { %v1688_v30 = vsel %vm1672_vm13, %v1664_v23, %v1680_v26  ;;  %v2273_v31 = vadd.f32 %v2255_v28, %v2215_v7  ;;  %v1631_v32 = vpop.f32.mrb[21].mxu0 }
 0x409   : > { %v1694_v34 = vpack.c.bf16 %v1688_v30, %v1687_v29  ;;  %v1686_v24 = vsel %vm1670_vm14, %v1662_v25, %v1678_v27  ;;  %v2274_v35 = vadd.f32 %v1631_v32, %v1343_v8  ;;  %v2256_v36 = vpop.f32.mrb[22].mxu0 }
 0x40a   : > { %v1667_v37 = vadd.f32 %v2273_v31, %v2030_v12  ;;  %v2275_v38 = vadd.f32 %v2256_v36, %v2216_v9  ;;  %v1634_v39 = vpop.f32.mrb[23].mxu0  ;;  %v1693_v40 = vpack.c.bf16 %v1686_v24, %v1685_v33 }
 0x40b   : > { %v1665_v41 = vadd.f32 %v2274_v35, %v2030_v12  ;;  %v2276_v42 = vadd.f32 %v1634_v39, %v1346_v10 }
 0x40c   : > { %v1683_v43 = vmul.f32 0.1, %v1667_v37  ;;  %v1668_v44 = vadd.f32 %v2275_v38, %v2030_v12  ;;  %2261 = vmatprep.mubr.msk.bf16.mxu1 %vm436_vm0, %v1693_v40  ;;  %vm1675_vm15 = vcmp.gt.f32.partialorder %v1667_v37, 0.0 }
 0x40d   : > { %v1681_v45 = vmul.f32 0.1, %v1665_v41  ;;  %v1666_v46 = vadd.f32 %v2276_v42, %v2030_v12  ;;  %2262 = vmatmul.mubr.msk.bf16.vlgmr.msra.gmra.mrb[16].mxu1 %vm436_vm0, %v1694_v34  ;;  %vm1673_vm1 = vcmp.gt.f32.partialorder %v1665_v41, 0.0 }
 0x40e   : > { %vm1676_vm3 = vcmp.gt.f32.partialorder %v1668_v44, 0.0  ;;  %v1684_v47 = vmul.f32 0.1, %v1668_v44  ;;  %v1691_v50 = vsel %vm1675_vm15, %v1667_v37, %v1683_v43 }
 0x40f   : > { %vm1674_vm4 = vcmp.gt.f32.partialorder %v1666_v46, 0.0  ;;  %v1682_v49 = vmul.f32 0.1, %v1666_v46  ;;  %v1689_v52 = vsel %vm1673_vm1, %v1665_v41, %v1681_v45 }
 0x410   : > { %v1692_v51 = vsel %vm1676_vm3, %v1668_v44, %v1684_v47 }
 0x411   : > { %v1690_v48 = vsel %vm1674_vm4, %v1666_v46, %v1682_v49  ;;  %v1696_v53 = vpack.c.bf16 %v1692_v51, %v1691_v50 }
 0x412   : > { %v1695_v54 = vpack.c.bf16 %v1690_v48, %v1689_v52 }
 0x414   : > { %2265 = vmatprep.mubr.msk.bf16.mxu1 %vm436_vm0, %v1695_v54 }
 0x415   : > { %2266 = vmatmul.mubr.msk.bf16.gmra.mrb[20].mxu1 %vm436_vm0, %v1696_v53 }
 0x4e0   : > { %v2263_v55 = vpop.f32.mrb[16].mxu1 }
 0x4e1   : > { %v1766_v57 = vpop.f32.mrb[17].mxu1  ;;  %v1775_v59 = vadd.f32 %v2263_v55, %v2031_v56 }
 0x4e2   : > { %v2264_v58 = vpop.f32.mrb[18].mxu1  ;;  %v1767_v62 = vadd.f32 %v2031_v56, %v1766_v57 }
 0x4e3   : > { %v1778_v60 = vadd.f32 %v2264_v58, %v2031_v56  ;;  %v1769_v61 = vpop.f32.mrb[19].mxu1 }
 0x4e4   : > { %v1770_v63 = vadd.f32 %v2031_v56, %v1769_v61 }
 0x4e5   : > { %v2074_v0 = vpack.c.bf16 %v1778_v60, %v1775_v59 }
 0x4e6   : > { %v2069_v2 = vpack.c.bf16 %v1770_v63, %v1767_v62 }
 0x4e7   : > { %2086 = vst [vmem:[%s305_s15 + $0x8] sm:$0xff] %v2074_v0  }
 0x4e8   : > { %2070 = vst [vmem:[%s305_s15] sm:$0xff] %v2069_v2   ;;  %v2267_v3 = vpop.f32.mrb[20].mxu1 }
 0x4e9   : > { %v1782_v4 = vpop.f32.mrb[21].mxu1  ;;  %v1791_v6 = vadd.f32 %v2267_v3, %v2031_v56 }
 0x4ea   : > { %v2268_v5 = vpop.f32.mrb[22].mxu1  ;;  %v1783_v9 = vadd.f32 %v2031_v56, %v1782_v4 }
 0x4eb   : > { %v1794_v7 = vadd.f32 %v2268_v5, %v2031_v56  ;;  %v1785_v8 = vpop.f32.mrb[23].mxu1 }
 0x4ec   : > { %v1786_v10 = vadd.f32 %v2031_v56, %v1785_v8 }
 0x4ed   : > { %v2084_v11 = vpack.c.bf16 %v1794_v7, %v1791_v6 }
 0x4ee   : > { %v2079_v12 = vpack.c.bf16 %v1786_v10, %v1783_v9 }
 0x4ef   : > { %2088 = vst [vmem:[%s305_s15 + $0x18] sm:$0xff] %v2084_v11  }
 0x4f0   : > { %2087 = vst [vmem:[%s305_s15 + $0x10] sm:$0xff] %v2079_v12  }
 0x4f1 PF: > { %s18_s27 = sadd.s32 1, %s2388_s27  }
 0x4f2   : > { %p15_p4 = scmp.ge.s32.totalorder %s18_s27, 4  }
 0x4f4   :  { %17 = sbr.rel (!%p15_p4) target bundleno = 1 (0x1), region = 89 }

</bundles_post_ra>
